<compile_context>
chip_gen: v7x
topology: tpu7x:2x2x1
jax: 0.10.0
libtpu: 0.0.40
codegen_flags: <defaults>
</compile_context>

<pallas_src>
import jax
import jax.numpy as jnp
from jax.experimental import pallas as pl
from jax.experimental.pallas import tpu as pltpu


def mlp_tiny_kernel(x_ref, w1_ref, b1_ref, w2_ref, b2_ref, o_ref):
    # x_ref : (cin, TR, 128)      VMEM  (pixels dense on sublanes x lanes)
    # w1_ref: (h1, cin)           SMEM  (scalar reads)
    # b1_ref: (h1,)               SMEM
    # w2_ref: (planes, h1)        SMEM
    # b2_ref: (planes,)           SMEM
    # o_ref : (planes, TR, 128)   VMEM
    cin = x_ref.shape[0]
    h1 = w1_ref.shape[0]
    planes = o_ref.shape[0]

    # Hoist all SMEM scalar reads out of the pixel math (read once per step).
    w1 = [[w1_ref[o, c] for c in range(cin)] for o in range(h1)]
    b1 = [b1_ref[o] for o in range(h1)]
    w2 = [[w2_ref[p, o] for o in range(h1)] for p in range(planes)]
    b2 = [b2_ref[p] for p in range(planes)]

    xs = []
    for c in range(cin):
        xc = x_ref[c]
        if xc.dtype != jnp.float32:
            xc = xc.astype(jnp.float32)
        xs.append(xc)                              # (TR, 128) f32, lane-dense

    # Fused layer1 + SiLU + layer2: per hidden channel o, build h_o and fold
    # it straight into the `planes` accumulators (h_o never stays live).
    ys = [None] * planes
    for o in range(h1):
        a = xs[0] * w1[o][0]
        for c in range(1, cin):
            a = a + xs[c] * w1[o][c]
        a = a + b1[o]
        # SiLU(a) = a * sigmoid(a); exp + approx-reciprocal both go to the EUP.
        s = pl.reciprocal(1.0 + jnp.exp(-a), approx=True)
        h = a * s
        for p in range(planes):
            t = h * w2[p][o]
            ys[p] = t if ys[p] is None else ys[p] + t

    for p in range(planes):
        o_ref[p] = (ys[p] + b2[p]).astype(o_ref.dtype)


def _pick_tiling(rows_raw, cin, planes, *, min_steps=4, max_rows_cap=1024):
    """Choose (tile_rows, grid, padded_rows).

    tile_rows is a multiple of 8 (sublane alignment).  We target >= min_steps
    grid steps (v7x: 2 TCs x >=2 pipelined steps each) while keeping the tile
    as large as a conservative VMEM budget allows (large tiles amortize the
    ~0.35us/step overhead and reach HBM roofline).
    """
    io_bytes_per_row = (cin + planes) * 128 * 4          # f32 in+out per row
    budget = 16 << 20                                    # double-buffered I/O
    max_rows = (budget // (2 * io_bytes_per_row)) // 8 * 8
    max_rows = max(8, min(max_rows_cap, max_rows))

    r8 = ((rows_raw + 7) // 8) * 8                       # rows, 8-aligned
    want = -(-r8 // min_steps)                           # ceil(r8 / min_steps)
    tile = min(max_rows, max(8, ((want + 7) // 8) * 8))
    grid = -(-r8 // tile)
    padded_rows = grid * tile
    return tile, grid, padded_rows


def mlp_tiny_forward(x, w1, b1, w2, b2):
    """x: (2, H, W) float32 (the PyTorch forward input before unsqueeze).

    Returns (1, planes, H, W), matching the PyTorch module output.
    """
    cin, H, W = x.shape
    assert cin == 2
    h1 = w1.shape[0]          # 8
    planes = w2.shape[0]

    P = H * W
    tile_r, grid_steps, rows = _pick_tiling(-(-P // 128), cin, planes)
    P_pad = rows * 128

    # NCHW -> (C, P) -> zero-pad pixel axis -> (C, rows, 128).  For aligned
    # sizes (P % (tile_r*128) == 0) the pad/slice are no-ops.
    x_flat = x.reshape(cin, P)
    if P_pad != P:
        x_flat = jnp.pad(x_flat, ((0, 0), (0, P_pad - P)))
    x_cp = x_flat.reshape(cin, rows, 128)

    # (Cout, Cin, 1, 1) -> (Cout, Cin) scalar tables for SMEM.
    w1_2d = w1.reshape(h1, cin)
    w2_2d = w2.reshape(planes, h1)

    # Explicit VMEM budget: double-buffered in/out tiles + fused-intermediate
    # working set + headroom (v7x has only 64 MiB physical / 32 MiB default).
    bpr = 128 * 4
    in_bytes = cin * tile_r * bpr
    out_bytes = planes * tile_r * bpr
    scratch_est = (planes + 4) * tile_r * bpr
    vmem_limit = min(64 << 20,
                     max(16 << 20, 2 * (in_bytes + out_bytes) + scratch_est + (4 << 20)))

    out = pl.pallas_call(
        mlp_tiny_kernel,
        out_shape=jax.ShapeDtypeStruct((planes, rows, 128), x.dtype),
        grid_spec=pltpu.PrefetchScalarGridSpec(
            num_scalar_prefetch=0,
            grid=(grid_steps,),
            in_specs=[
                pl.BlockSpec((cin, tile_r, 128), lambda i: (0, i, 0)),     # x tile
                pl.BlockSpec(memory_space=pltpu.MemorySpace.SMEM),         # w1
                pl.BlockSpec(memory_space=pltpu.MemorySpace.SMEM),         # b1
                pl.BlockSpec(memory_space=pltpu.MemorySpace.SMEM),         # w2
                pl.BlockSpec(memory_space=pltpu.MemorySpace.SMEM),         # b2
            ],
            out_specs=pl.BlockSpec((planes, tile_r, 128), lambda i: (0, i, 0)),
        ),
        compiler_params=pltpu.CompilerParams(
            dimension_semantics=("parallel",),
            vmem_limit_bytes=vmem_limit),
    )(x_cp, w1_2d, b1, w2_2d, b2)

    # (planes, rows, 128) -> drop pad -> (1, planes, H, W).
    y = out.reshape(planes, P_pad)
    if P_pad != P:
        y = y[:, :P]
    return y.reshape(1, planes, H, W)


def _init_params(key, planes):
    """Deterministic synthetic params with the shapes of the PyTorch module."""
    k1, k2, k3, k4 = jax.random.split(key, 4)
    # Conv2d(2, 8, 1):  weight (8, 2, 1, 1), bias (8,)
    w1 = jax.random.normal(k1, (8, 2, 1, 1), jnp.float32) * 0.5
    b1 = jax.random.normal(k2, (8,), jnp.float32) * 0.1
    # Conv2d(8, planes, 1): weight (planes, 8, 1, 1), bias (planes,)
    w2 = jax.random.normal(k3, (planes, 8, 1, 1), jnp.float32) * 0.5
    b2 = jax.random.normal(k4, (planes,), jnp.float32) * 0.1
    return w1, b1, w2, b2


def _reference_forward(x, w1, b1, w2, b2):
    """Pure-JAX reference of the PyTorch forward (1x1 convs as einsums)."""
    cin, H, W = x.shape
    h1 = w1.shape[0]
    planes = w2.shape[0]
    h = jnp.einsum("oc,chw->ohw", w1.reshape(h1, cin), x) + b1[:, None, None]
    h = h * jax.nn.sigmoid(h)
    y = jnp.einsum("oc,chw->ohw", w2.reshape(planes, h1), h) + b2[:, None, None]
    return y[None]  # (1, planes, H, W)


def _check(x, w1, b1, w2, b2, planes, H, W):
    out = jax.block_until_ready(mlp_tiny_forward(x, w1, b1, w2, b2))
    ref = _reference_forward(x, w1, b1, w2, b2)
    assert out.shape == (1, planes, H, W), out.shape
    # Tolerance loosened vs exact-sigmoid path: SiLU uses the EUP approx
    # reciprocal (relative error ~1e-4), amplified slightly through layer 2.
    assert jnp.allclose(out, ref, atol=2e-2, rtol=1e-2), (
        "mismatch vs reference: max abs err = %g"
        % float(jnp.max(jnp.abs(out - ref))))


if __name__ == "__main__":
    planes = 4
    key = jax.random.PRNGKey(0)
    kx, kp, kx2 = jax.random.split(key, 3)
    w1, b1, w2, b2 = _init_params(kp, planes)

    # Small demo shape (module-consistent): x = (2, 16, 16).
    H = W = 16
    x = jax.random.normal(kx, (2, H, W), jnp.float32)
    _check(x, w1, b1, w2, b2, planes, H, W)

    # Larger shape that actually exercises the tiling / multi-step grid path
    # (rows = 2048 -> tile 512, grid 4).
    H2 = W2 = 512
    x2 = jax.random.normal(kx2, (2, H2, W2), jnp.float32)
    _check(x2, w1, b1, w2, b2, planes, H2, W2)

    print("KERNEL_OK")
</pallas_src>

<mosaic_0001>
module attributes {stable_mosaic.version = 11 : i64} {
  func.func @mlp_tiny_kernel(%arg0: i32, %arg1: memref<2x8x128xf32, #tpu.memory_space<vmem>>, %arg2: memref<8x2xf32, #tpu.memory_space<smem>>, %arg3: memref<8xf32, #tpu.memory_space<smem>>, %arg4: memref<4x8xf32, #tpu.memory_space<smem>>, %arg5: memref<4xf32, #tpu.memory_space<smem>>, %arg6: memref<4x8x128xf32, #tpu.memory_space<vmem>>) attributes {dimension_semantics = [#tpu.dimension_semantics<parallel>], iteration_bounds = array<i64: 1>, scalar_prefetch = 0 : i64, scratch_operands = 0 : i64, tpu.core_type = #tpu.core_type<tc>, window_params = [{transform_indices = @transform_0, window_bounds = array<i64: 2, 8, 128>}, {transform_indices = @transform_1, window_bounds = array<i64: 8, 2>}, {transform_indices = @transform_2, window_bounds = array<i64: 8>}, {transform_indices = @transform_3, window_bounds = array<i64: 4, 8>}, {transform_indices = @transform_4, window_bounds = array<i64: 4>}, {transform_indices = @transform_5, window_bounds = array<i64: 4, 8, 128>}]} {
    %c0 = arith.constant 0 : index
    %c0_0 = arith.constant 0 : index
    %0 = memref.load %arg2[%c0, %c0_0] : memref<8x2xf32, #tpu.memory_space<smem>>
    %c0_1 = arith.constant 0 : index
    %c1 = arith.constant 1 : index
    %1 = memref.load %arg2[%c0_1, %c1] : memref<8x2xf32, #tpu.memory_space<smem>>
    %c1_2 = arith.constant 1 : index
    %c0_3 = arith.constant 0 : index
    %2 = memref.load %arg2[%c1_2, %c0_3] : memref<8x2xf32, #tpu.memory_space<smem>>
    %c1_4 = arith.constant 1 : index
    %c1_5 = arith.constant 1 : index
    %3 = memref.load %arg2[%c1_4, %c1_5] : memref<8x2xf32, #tpu.memory_space<smem>>
    %c2 = arith.constant 2 : index
    %c0_6 = arith.constant 0 : index
    %4 = memref.load %arg2[%c2, %c0_6] : memref<8x2xf32, #tpu.memory_space<smem>>
    %c2_7 = arith.constant 2 : index
    %c1_8 = arith.constant 1 : index
    %5 = memref.load %arg2[%c2_7, %c1_8] : memref<8x2xf32, #tpu.memory_space<smem>>
    %c3 = arith.constant 3 : index
    %c0_9 = arith.constant 0 : index
    %6 = memref.load %arg2[%c3, %c0_9] : memref<8x2xf32, #tpu.memory_space<smem>>
    %c3_10 = arith.constant 3 : index
    %c1_11 = arith.constant 1 : index
    %7 = memref.load %arg2[%c3_10, %c1_11] : memref<8x2xf32, #tpu.memory_space<smem>>
    %c4 = arith.constant 4 : index
    %c0_12 = arith.constant 0 : index
    %8 = memref.load %arg2[%c4, %c0_12] : memref<8x2xf32, #tpu.memory_space<smem>>
    %c4_13 = arith.constant 4 : index
    %c1_14 = arith.constant 1 : index
    %9 = memref.load %arg2[%c4_13, %c1_14] : memref<8x2xf32, #tpu.memory_space<smem>>
    %c5 = arith.constant 5 : index
    %c0_15 = arith.constant 0 : index
    %10 = memref.load %arg2[%c5, %c0_15] : memref<8x2xf32, #tpu.memory_space<smem>>
    %c5_16 = arith.constant 5 : index
    %c1_17 = arith.constant 1 : index
    %11 = memref.load %arg2[%c5_16, %c1_17] : memref<8x2xf32, #tpu.memory_space<smem>>
    %c6 = arith.constant 6 : index
    %c0_18 = arith.constant 0 : index
    %12 = memref.load %arg2[%c6, %c0_18] : memref<8x2xf32, #tpu.memory_space<smem>>
    %c6_19 = arith.constant 6 : index
    %c1_20 = arith.constant 1 : index
    %13 = memref.load %arg2[%c6_19, %c1_20] : memref<8x2xf32, #tpu.memory_space<smem>>
    %c7 = arith.constant 7 : index
    %c0_21 = arith.constant 0 : index
    %14 = memref.load %arg2[%c7, %c0_21] : memref<8x2xf32, #tpu.memory_space<smem>>
    %c7_22 = arith.constant 7 : index
    %c1_23 = arith.constant 1 : index
    %15 = memref.load %arg2[%c7_22, %c1_23] : memref<8x2xf32, #tpu.memory_space<smem>>
    %c0_24 = arith.constant 0 : index
    %16 = memref.load %arg3[%c0_24] : memref<8xf32, #tpu.memory_space<smem>>
    %c1_25 = arith.constant 1 : index
    %17 = memref.load %arg3[%c1_25] : memref<8xf32, #tpu.memory_space<smem>>
    %c2_26 = arith.constant 2 : index
    %18 = memref.load %arg3[%c2_26] : memref<8xf32, #tpu.memory_space<smem>>
    %c3_27 = arith.constant 3 : index
    %19 = memref.load %arg3[%c3_27] : memref<8xf32, #tpu.memory_space<smem>>
    %c4_28 = arith.constant 4 : index
    %20 = memref.load %arg3[%c4_28] : memref<8xf32, #tpu.memory_space<smem>>
    %c5_29 = arith.constant 5 : index
    %21 = memref.load %arg3[%c5_29] : memref<8xf32, #tpu.memory_space<smem>>
    %c6_30 = arith.constant 6 : index
    %22 = memref.load %arg3[%c6_30] : memref<8xf32, #tpu.memory_space<smem>>
    %c7_31 = arith.constant 7 : index
    %23 = memref.load %arg3[%c7_31] : memref<8xf32, #tpu.memory_space<smem>>
    %c0_32 = arith.constant 0 : index
    %c0_33 = arith.constant 0 : index
    %24 = memref.load %arg4[%c0_32, %c0_33] : memref<4x8xf32, #tpu.memory_space<smem>>
    %c0_34 = arith.constant 0 : index
    %c1_35 = arith.constant 1 : index
    %25 = memref.load %arg4[%c0_34, %c1_35] : memref<4x8xf32, #tpu.memory_space<smem>>
    %c0_36 = arith.constant 0 : index
    %c2_37 = arith.constant 2 : index
    %26 = memref.load %arg4[%c0_36, %c2_37] : memref<4x8xf32, #tpu.memory_space<smem>>
    %c0_38 = arith.constant 0 : index
    %c3_39 = arith.constant 3 : index
    %27 = memref.load %arg4[%c0_38, %c3_39] : memref<4x8xf32, #tpu.memory_space<smem>>
    %c0_40 = arith.constant 0 : index
    %c4_41 = arith.constant 4 : index
    %28 = memref.load %arg4[%c0_40, %c4_41] : memref<4x8xf32, #tpu.memory_space<smem>>
    %c0_42 = arith.constant 0 : index
    %c5_43 = arith.constant 5 : index
    %29 = memref.load %arg4[%c0_42, %c5_43] : memref<4x8xf32, #tpu.memory_space<smem>>
    %c0_44 = arith.constant 0 : index
    %c6_45 = arith.constant 6 : index
    %30 = memref.load %arg4[%c0_44, %c6_45] : memref<4x8xf32, #tpu.memory_space<smem>>
    %c0_46 = arith.constant 0 : index
    %c7_47 = arith.constant 7 : index
    %31 = memref.load %arg4[%c0_46, %c7_47] : memref<4x8xf32, #tpu.memory_space<smem>>
    %c1_48 = arith.constant 1 : index
    %c0_49 = arith.constant 0 : index
    %32 = memref.load %arg4[%c1_48, %c0_49] : memref<4x8xf32, #tpu.memory_space<smem>>
    %c1_50 = arith.constant 1 : index
    %c1_51 = arith.constant 1 : index
    %33 = memref.load %arg4[%c1_50, %c1_51] : memref<4x8xf32, #tpu.memory_space<smem>>
    %c1_52 = arith.constant 1 : index
    %c2_53 = arith.constant 2 : index
    %34 = memref.load %arg4[%c1_52, %c2_53] : memref<4x8xf32, #tpu.memory_space<smem>>
    %c1_54 = arith.constant 1 : index
    %c3_55 = arith.constant 3 : index
    %35 = memref.load %arg4[%c1_54, %c3_55] : memref<4x8xf32, #tpu.memory_space<smem>>
    %c1_56 = arith.constant 1 : index
    %c4_57 = arith.constant 4 : index
    %36 = memref.load %arg4[%c1_56, %c4_57] : memref<4x8xf32, #tpu.memory_space<smem>>
    %c1_58 = arith.constant 1 : index
    %c5_59 = arith.constant 5 : index
    %37 = memref.load %arg4[%c1_58, %c5_59] : memref<4x8xf32, #tpu.memory_space<smem>>
    %c1_60 = arith.constant 1 : index
    %c6_61 = arith.constant 6 : index
    %38 = memref.load %arg4[%c1_60, %c6_61] : memref<4x8xf32, #tpu.memory_space<smem>>
    %c1_62 = arith.constant 1 : index
    %c7_63 = arith.constant 7 : index
    %39 = memref.load %arg4[%c1_62, %c7_63] : memref<4x8xf32, #tpu.memory_space<smem>>
    %c2_64 = arith.constant 2 : index
    %c0_65 = arith.constant 0 : index
    %40 = memref.load %arg4[%c2_64, %c0_65] : memref<4x8xf32, #tpu.memory_space<smem>>
    %c2_66 = arith.constant 2 : index
    %c1_67 = arith.constant 1 : index
    %41 = memref.load %arg4[%c2_66, %c1_67] : memref<4x8xf32, #tpu.memory_space<smem>>
    %c2_68 = arith.constant 2 : index
    %c2_69 = arith.constant 2 : index
    %42 = memref.load %arg4[%c2_68, %c2_69] : memref<4x8xf32, #tpu.memory_space<smem>>
    %c2_70 = arith.constant 2 : index
    %c3_71 = arith.constant 3 : index
    %43 = memref.load %arg4[%c2_70, %c3_71] : memref<4x8xf32, #tpu.memory_space<smem>>
    %c2_72 = arith.constant 2 : index
    %c4_73 = arith.constant 4 : index
    %44 = memref.load %arg4[%c2_72, %c4_73] : memref<4x8xf32, #tpu.memory_space<smem>>
    %c2_74 = arith.constant 2 : index
    %c5_75 = arith.constant 5 : index
    %45 = memref.load %arg4[%c2_74, %c5_75] : memref<4x8xf32, #tpu.memory_space<smem>>
    %c2_76 = arith.constant 2 : index
    %c6_77 = arith.constant 6 : index
    %46 = memref.load %arg4[%c2_76, %c6_77] : memref<4x8xf32, #tpu.memory_space<smem>>
    %c2_78 = arith.constant 2 : index
    %c7_79 = arith.constant 7 : index
    %47 = memref.load %arg4[%c2_78, %c7_79] : memref<4x8xf32, #tpu.memory_space<smem>>
    %c3_80 = arith.constant 3 : index
    %c0_81 = arith.constant 0 : index
    %48 = memref.load %arg4[%c3_80, %c0_81] : memref<4x8xf32, #tpu.memory_space<smem>>
    %c3_82 = arith.constant 3 : index
    %c1_83 = arith.constant 1 : index
    %49 = memref.load %arg4[%c3_82, %c1_83] : memref<4x8xf32, #tpu.memory_space<smem>>
    %c3_84 = arith.constant 3 : index
    %c2_85 = arith.constant 2 : index
    %50 = memref.load %arg4[%c3_84, %c2_85] : memref<4x8xf32, #tpu.memory_space<smem>>
    %c3_86 = arith.constant 3 : index
    %c3_87 = arith.constant 3 : index
    %51 = memref.load %arg4[%c3_86, %c3_87] : memref<4x8xf32, #tpu.memory_space<smem>>
    %c3_88 = arith.constant 3 : index
    %c4_89 = arith.constant 4 : index
    %52 = memref.load %arg4[%c3_88, %c4_89] : memref<4x8xf32, #tpu.memory_space<smem>>
    %c3_90 = arith.constant 3 : index
    %c5_91 = arith.constant 5 : index
    %53 = memref.load %arg4[%c3_90, %c5_91] : memref<4x8xf32, #tpu.memory_space<smem>>
    %c3_92 = arith.constant 3 : index
    %c6_93 = arith.constant 6 : index
    %54 = memref.load %arg4[%c3_92, %c6_93] : memref<4x8xf32, #tpu.memory_space<smem>>
    %c3_94 = arith.constant 3 : index
    %c7_95 = arith.constant 7 : index
    %55 = memref.load %arg4[%c3_94, %c7_95] : memref<4x8xf32, #tpu.memory_space<smem>>
    %c0_96 = arith.constant 0 : index
    %56 = memref.load %arg5[%c0_96] : memref<4xf32, #tpu.memory_space<smem>>
    %c1_97 = arith.constant 1 : index
    %57 = memref.load %arg5[%c1_97] : memref<4xf32, #tpu.memory_space<smem>>
    %c2_98 = arith.constant 2 : index
    %58 = memref.load %arg5[%c2_98] : memref<4xf32, #tpu.memory_space<smem>>
    %c3_99 = arith.constant 3 : index
    %59 = memref.load %arg5[%c3_99] : memref<4xf32, #tpu.memory_space<smem>>
    %c0_100 = arith.constant 0 : index
    %c0_101 = arith.constant 0 : index
    %c0_102 = arith.constant 0 : index
    %60 = vector.load %arg1[%c0_100, %c0_101, %c0_102] : memref<2x8x128xf32, #tpu.memory_space<vmem>>, vector<1x8x128xf32>
    %61 = vector.shape_cast %60 : vector<1x8x128xf32> to vector<8x128xf32>
    %c1_103 = arith.constant 1 : index
    %c0_104 = arith.constant 0 : index
    %c0_105 = arith.constant 0 : index
    %62 = vector.load %arg1[%c1_103, %c0_104, %c0_105] : memref<2x8x128xf32, #tpu.memory_space<vmem>>, vector<1x8x128xf32>
    %63 = vector.shape_cast %62 : vector<1x8x128xf32> to vector<8x128xf32>
    %64 = vector.broadcast %0 : f32 to vector<8x128xf32>
    %65 = arith.mulf %61, %64 : vector<8x128xf32>
    %66 = vector.broadcast %1 : f32 to vector<8x128xf32>
    %67 = arith.mulf %63, %66 : vector<8x128xf32>
    %68 = arith.addf %65, %67 : vector<8x128xf32>
    %69 = vector.broadcast %16 : f32 to vector<8x128xf32>
    %70 = arith.addf %68, %69 : vector<8x128xf32>
    %cst = arith.constant 0.000000e+00 : f32
    %71 = vector.broadcast %cst : f32 to vector<8x128xf32>
    %72 = arith.subf %71, %70 : vector<8x128xf32>
    %73 = math.exp %72 : vector<8x128xf32>
    %cst_106 = arith.constant 1.000000e+00 : f32
    %74 = vector.broadcast %cst_106 : f32 to vector<8x128xf32>
    %75 = arith.addf %74, %73 : vector<8x128xf32>
    %76 = tpu.reciprocal %75 {approx = true} : vector<8x128xf32> -> vector<8x128xf32>
    %77 = arith.mulf %70, %76 : vector<8x128xf32>
    %78 = vector.broadcast %24 : f32 to vector<8x128xf32>
    %79 = arith.mulf %77, %78 : vector<8x128xf32>
    %80 = vector.broadcast %32 : f32 to vector<8x128xf32>
    %81 = arith.mulf %77, %80 : vector<8x128xf32>
    %82 = vector.broadcast %40 : f32 to vector<8x128xf32>
    %83 = arith.mulf %77, %82 : vector<8x128xf32>
    %84 = vector.broadcast %48 : f32 to vector<8x128xf32>
    %85 = arith.mulf %77, %84 : vector<8x128xf32>
    %86 = vector.broadcast %2 : f32 to vector<8x128xf32>
    %87 = arith.mulf %61, %86 : vector<8x128xf32>
    %88 = vector.broadcast %3 : f32 to vector<8x128xf32>
    %89 = arith.mulf %63, %88 : vector<8x128xf32>
    %90 = arith.addf %87, %89 : vector<8x128xf32>
    %91 = vector.broadcast %17 : f32 to vector<8x128xf32>
    %92 = arith.addf %90, %91 : vector<8x128xf32>
    %cst_107 = arith.constant 0.000000e+00 : f32
    %93 = vector.broadcast %cst_107 : f32 to vector<8x128xf32>
    %94 = arith.subf %93, %92 : vector<8x128xf32>
    %95 = math.exp %94 : vector<8x128xf32>
    %cst_108 = arith.constant 1.000000e+00 : f32
    %96 = vector.broadcast %cst_108 : f32 to vector<8x128xf32>
    %97 = arith.addf %96, %95 : vector<8x128xf32>
    %98 = tpu.reciprocal %97 {approx = true} : vector<8x128xf32> -> vector<8x128xf32>
    %99 = arith.mulf %92, %98 : vector<8x128xf32>
    %100 = vector.broadcast %25 : f32 to vector<8x128xf32>
    %101 = arith.mulf %99, %100 : vector<8x128xf32>
    %102 = arith.addf %79, %101 : vector<8x128xf32>
    %103 = vector.broadcast %33 : f32 to vector<8x128xf32>
    %104 = arith.mulf %99, %103 : vector<8x128xf32>
    %105 = arith.addf %81, %104 : vector<8x128xf32>
    %106 = vector.broadcast %41 : f32 to vector<8x128xf32>
    %107 = arith.mulf %99, %106 : vector<8x128xf32>
    %108 = arith.addf %83, %107 : vector<8x128xf32>
    %109 = vector.broadcast %49 : f32 to vector<8x128xf32>
    %110 = arith.mulf %99, %109 : vector<8x128xf32>
    %111 = arith.addf %85, %110 : vector<8x128xf32>
    %112 = vector.broadcast %4 : f32 to vector<8x128xf32>
    %113 = arith.mulf %61, %112 : vector<8x128xf32>
    %114 = vector.broadcast %5 : f32 to vector<8x128xf32>
    %115 = arith.mulf %63, %114 : vector<8x128xf32>
    %116 = arith.addf %113, %115 : vector<8x128xf32>
    %117 = vector.broadcast %18 : f32 to vector<8x128xf32>
    %118 = arith.addf %116, %117 : vector<8x128xf32>
    %cst_109 = arith.constant 0.000000e+00 : f32
    %119 = vector.broadcast %cst_109 : f32 to vector<8x128xf32>
    %120 = arith.subf %119, %118 : vector<8x128xf32>
    %121 = math.exp %120 : vector<8x128xf32>
    %cst_110 = arith.constant 1.000000e+00 : f32
    %122 = vector.broadcast %cst_110 : f32 to vector<8x128xf32>
    %123 = arith.addf %122, %121 : vector<8x128xf32>
    %124 = tpu.reciprocal %123 {approx = true} : vector<8x128xf32> -> vector<8x128xf32>
    %125 = arith.mulf %118, %124 : vector<8x128xf32>
    %126 = vector.broadcast %26 : f32 to vector<8x128xf32>
    %127 = arith.mulf %125, %126 : vector<8x128xf32>
    %128 = arith.addf %102, %127 : vector<8x128xf32>
    %129 = vector.broadcast %34 : f32 to vector<8x128xf32>
    %130 = arith.mulf %125, %129 : vector<8x128xf32>
    %131 = arith.addf %105, %130 : vector<8x128xf32>
    %132 = vector.broadcast %42 : f32 to vector<8x128xf32>
    %133 = arith.mulf %125, %132 : vector<8x128xf32>
    %134 = arith.addf %108, %133 : vector<8x128xf32>
    %135 = vector.broadcast %50 : f32 to vector<8x128xf32>
    %136 = arith.mulf %125, %135 : vector<8x128xf32>
    %137 = arith.addf %111, %136 : vector<8x128xf32>
    %138 = vector.broadcast %6 : f32 to vector<8x128xf32>
    %139 = arith.mulf %61, %138 : vector<8x128xf32>
    %140 = vector.broadcast %7 : f32 to vector<8x128xf32>
    %141 = arith.mulf %63, %140 : vector<8x128xf32>
    %142 = arith.addf %139, %141 : vector<8x128xf32>
    %143 = vector.broadcast %19 : f32 to vector<8x128xf32>
    %144 = arith.addf %142, %143 : vector<8x128xf32>
    %cst_111 = arith.constant 0.000000e+00 : f32
    %145 = vector.broadcast %cst_111 : f32 to vector<8x128xf32>
    %146 = arith.subf %145, %144 : vector<8x128xf32>
    %147 = math.exp %146 : vector<8x128xf32>
    %cst_112 = arith.constant 1.000000e+00 : f32
    %148 = vector.broadcast %cst_112 : f32 to vector<8x128xf32>
    %149 = arith.addf %148, %147 : vector<8x128xf32>
    %150 = tpu.reciprocal %149 {approx = true} : vector<8x128xf32> -> vector<8x128xf32>
    %151 = arith.mulf %144, %150 : vector<8x128xf32>
    %152 = vector.broadcast %27 : f32 to vector<8x128xf32>
    %153 = arith.mulf %151, %152 : vector<8x128xf32>
    %154 = arith.addf %128, %153 : vector<8x128xf32>
    %155 = vector.broadcast %35 : f32 to vector<8x128xf32>
    %156 = arith.mulf %151, %155 : vector<8x128xf32>
    %157 = arith.addf %131, %156 : vector<8x128xf32>
    %158 = vector.broadcast %43 : f32 to vector<8x128xf32>
    %159 = arith.mulf %151, %158 : vector<8x128xf32>
    %160 = arith.addf %134, %159 : vector<8x128xf32>
    %161 = vector.broadcast %51 : f32 to vector<8x128xf32>
    %162 = arith.mulf %151, %161 : vector<8x128xf32>
    %163 = arith.addf %137, %162 : vector<8x128xf32>
    %164 = vector.broadcast %8 : f32 to vector<8x128xf32>
    %165 = arith.mulf %61, %164 : vector<8x128xf32>
    %166 = vector.broadcast %9 : f32 to vector<8x128xf32>
    %167 = arith.mulf %63, %166 : vector<8x128xf32>
    %168 = arith.addf %165, %167 : vector<8x128xf32>
    %169 = vector.broadcast %20 : f32 to vector<8x128xf32>
    %170 = arith.addf %168, %169 : vector<8x128xf32>
    %cst_113 = arith.constant 0.000000e+00 : f32
    %171 = vector.broadcast %cst_113 : f32 to vector<8x128xf32>
    %172 = arith.subf %171, %170 : vector<8x128xf32>
    %173 = math.exp %172 : vector<8x128xf32>
    %cst_114 = arith.constant 1.000000e+00 : f32
    %174 = vector.broadcast %cst_114 : f32 to vector<8x128xf32>
    %175 = arith.addf %174, %173 : vector<8x128xf32>
    %176 = tpu.reciprocal %175 {approx = true} : vector<8x128xf32> -> vector<8x128xf32>
    %177 = arith.mulf %170, %176 : vector<8x128xf32>
    %178 = vector.broadcast %28 : f32 to vector<8x128xf32>
    %179 = arith.mulf %177, %178 : vector<8x128xf32>
    %180 = arith.addf %154, %179 : vector<8x128xf32>
    %181 = vector.broadcast %36 : f32 to vector<8x128xf32>
    %182 = arith.mulf %177, %181 : vector<8x128xf32>
    %183 = arith.addf %157, %182 : vector<8x128xf32>
    %184 = vector.broadcast %44 : f32 to vector<8x128xf32>
    %185 = arith.mulf %177, %184 : vector<8x128xf32>
    %186 = arith.addf %160, %185 : vector<8x128xf32>
    %187 = vector.broadcast %52 : f32 to vector<8x128xf32>
    %188 = arith.mulf %177, %187 : vector<8x128xf32>
    %189 = arith.addf %163, %188 : vector<8x128xf32>
    %190 = vector.broadcast %10 : f32 to vector<8x128xf32>
    %191 = arith.mulf %61, %190 : vector<8x128xf32>
    %192 = vector.broadcast %11 : f32 to vector<8x128xf32>
    %193 = arith.mulf %63, %192 : vector<8x128xf32>
    %194 = arith.addf %191, %193 : vector<8x128xf32>
    %195 = vector.broadcast %21 : f32 to vector<8x128xf32>
    %196 = arith.addf %194, %195 : vector<8x128xf32>
    %cst_115 = arith.constant 0.000000e+00 : f32
    %197 = vector.broadcast %cst_115 : f32 to vector<8x128xf32>
    %198 = arith.subf %197, %196 : vector<8x128xf32>
    %199 = math.exp %198 : vector<8x128xf32>
    %cst_116 = arith.constant 1.000000e+00 : f32
    %200 = vector.broadcast %cst_116 : f32 to vector<8x128xf32>
    %201 = arith.addf %200, %199 : vector<8x128xf32>
    %202 = tpu.reciprocal %201 {approx = true} : vector<8x128xf32> -> vector<8x128xf32>
    %203 = arith.mulf %196, %202 : vector<8x128xf32>
    %204 = vector.broadcast %29 : f32 to vector<8x128xf32>
    %205 = arith.mulf %203, %204 : vector<8x128xf32>
    %206 = arith.addf %180, %205 : vector<8x128xf32>
    %207 = vector.broadcast %37 : f32 to vector<8x128xf32>
    %208 = arith.mulf %203, %207 : vector<8x128xf32>
    %209 = arith.addf %183, %208 : vector<8x128xf32>
    %210 = vector.broadcast %45 : f32 to vector<8x128xf32>
    %211 = arith.mulf %203, %210 : vector<8x128xf32>
    %212 = arith.addf %186, %211 : vector<8x128xf32>
    %213 = vector.broadcast %53 : f32 to vector<8x128xf32>
    %214 = arith.mulf %203, %213 : vector<8x128xf32>
    %215 = arith.addf %189, %214 : vector<8x128xf32>
    %216 = vector.broadcast %12 : f32 to vector<8x128xf32>
    %217 = arith.mulf %61, %216 : vector<8x128xf32>
    %218 = vector.broadcast %13 : f32 to vector<8x128xf32>
    %219 = arith.mulf %63, %218 : vector<8x128xf32>
    %220 = arith.addf %217, %219 : vector<8x128xf32>
    %221 = vector.broadcast %22 : f32 to vector<8x128xf32>
    %222 = arith.addf %220, %221 : vector<8x128xf32>
    %cst_117 = arith.constant 0.000000e+00 : f32
    %223 = vector.broadcast %cst_117 : f32 to vector<8x128xf32>
    %224 = arith.subf %223, %222 : vector<8x128xf32>
    %225 = math.exp %224 : vector<8x128xf32>
    %cst_118 = arith.constant 1.000000e+00 : f32
    %226 = vector.broadcast %cst_118 : f32 to vector<8x128xf32>
    %227 = arith.addf %226, %225 : vector<8x128xf32>
    %228 = tpu.reciprocal %227 {approx = true} : vector<8x128xf32> -> vector<8x128xf32>
    %229 = arith.mulf %222, %228 : vector<8x128xf32>
    %230 = vector.broadcast %30 : f32 to vector<8x128xf32>
    %231 = arith.mulf %229, %230 : vector<8x128xf32>
    %232 = arith.addf %206, %231 : vector<8x128xf32>
    %233 = vector.broadcast %38 : f32 to vector<8x128xf32>
    %234 = arith.mulf %229, %233 : vector<8x128xf32>
    %235 = arith.addf %209, %234 : vector<8x128xf32>
    %236 = vector.broadcast %46 : f32 to vector<8x128xf32>
    %237 = arith.mulf %229, %236 : vector<8x128xf32>
    %238 = arith.addf %212, %237 : vector<8x128xf32>
    %239 = vector.broadcast %54 : f32 to vector<8x128xf32>
    %240 = arith.mulf %229, %239 : vector<8x128xf32>
    %241 = arith.addf %215, %240 : vector<8x128xf32>
    %242 = vector.broadcast %14 : f32 to vector<8x128xf32>
    %243 = arith.mulf %61, %242 : vector<8x128xf32>
    %244 = vector.broadcast %15 : f32 to vector<8x128xf32>
    %245 = arith.mulf %63, %244 : vector<8x128xf32>
    %246 = arith.addf %243, %245 : vector<8x128xf32>
    %247 = vector.broadcast %23 : f32 to vector<8x128xf32>
    %248 = arith.addf %246, %247 : vector<8x128xf32>
    %cst_119 = arith.constant 0.000000e+00 : f32
    %249 = vector.broadcast %cst_119 : f32 to vector<8x128xf32>
    %250 = arith.subf %249, %248 : vector<8x128xf32>
    %251 = math.exp %250 : vector<8x128xf32>
    %cst_120 = arith.constant 1.000000e+00 : f32
    %252 = vector.broadcast %cst_120 : f32 to vector<8x128xf32>
    %253 = arith.addf %252, %251 : vector<8x128xf32>
    %254 = tpu.reciprocal %253 {approx = true} : vector<8x128xf32> -> vector<8x128xf32>
    %255 = arith.mulf %248, %254 : vector<8x128xf32>
    %256 = vector.broadcast %31 : f32 to vector<8x128xf32>
    %257 = arith.mulf %255, %256 : vector<8x128xf32>
    %258 = arith.addf %232, %257 : vector<8x128xf32>
    %259 = vector.broadcast %39 : f32 to vector<8x128xf32>
    %260 = arith.mulf %255, %259 : vector<8x128xf32>
    %261 = arith.addf %235, %260 : vector<8x128xf32>
    %262 = vector.broadcast %47 : f32 to vector<8x128xf32>
    %263 = arith.mulf %255, %262 : vector<8x128xf32>
    %264 = arith.addf %238, %263 : vector<8x128xf32>
    %265 = vector.broadcast %55 : f32 to vector<8x128xf32>
    %266 = arith.mulf %255, %265 : vector<8x128xf32>
    %267 = arith.addf %241, %266 : vector<8x128xf32>
    %268 = vector.broadcast %56 : f32 to vector<8x128xf32>
    %269 = arith.addf %258, %268 : vector<8x128xf32>
    %c0_121 = arith.constant 0 : index
    %c0_122 = arith.constant 0 : index
    %c0_123 = arith.constant 0 : index
    %270 = vector.load %arg6[%c0_121, %c0_122, %c0_123] : memref<4x8x128xf32, #tpu.memory_space<vmem>>, vector<1x8x128xf32>
    %271 = vector.shape_cast %270 : vector<1x8x128xf32> to vector<8x128xf32>
    %272 = vector.shape_cast %269 : vector<8x128xf32> to vector<1x8x128xf32>
    tpu.vector_store %arg6[%c0_121, %c0_122, %c0_123], %272 {strides = array<i32>} : memref<4x8x128xf32, #tpu.memory_space<vmem>>, vector<1x8x128xf32>,
    %273 = vector.broadcast %57 : f32 to vector<8x128xf32>
    %274 = arith.addf %261, %273 : vector<8x128xf32>
    %c1_124 = arith.constant 1 : index
    %c0_125 = arith.constant 0 : index
    %c0_126 = arith.constant 0 : index
    %275 = vector.load %arg6[%c1_124, %c0_125, %c0_126] : memref<4x8x128xf32, #tpu.memory_space<vmem>>, vector<1x8x128xf32>
    %276 = vector.shape_cast %275 : vector<1x8x128xf32> to vector<8x128xf32>
    %277 = vector.shape_cast %274 : vector<8x128xf32> to vector<1x8x128xf32>
    tpu.vector_store %arg6[%c1_124, %c0_125, %c0_126], %277 {strides = array<i32>} : memref<4x8x128xf32, #tpu.memory_space<vmem>>, vector<1x8x128xf32>,
    %278 = vector.broadcast %58 : f32 to vector<8x128xf32>
    %279 = arith.addf %264, %278 : vector<8x128xf32>
    %c2_127 = arith.constant 2 : index
    %c0_128 = arith.constant 0 : index
    %c0_129 = arith.constant 0 : index
    %280 = vector.load %arg6[%c2_127, %c0_128, %c0_129] : memref<4x8x128xf32, #tpu.memory_space<vmem>>, vector<1x8x128xf32>
    %281 = vector.shape_cast %280 : vector<1x8x128xf32> to vector<8x128xf32>
    %282 = vector.shape_cast %279 : vector<8x128xf32> to vector<1x8x128xf32>
    tpu.vector_store %arg6[%c2_127, %c0_128, %c0_129], %282 {strides = array<i32>} : memref<4x8x128xf32, #tpu.memory_space<vmem>>, vector<1x8x128xf32>,
    %283 = vector.broadcast %59 : f32 to vector<8x128xf32>
    %284 = arith.addf %267, %283 : vector<8x128xf32>
    %c3_130 = arith.constant 3 : index
    %c0_131 = arith.constant 0 : index
    %c0_132 = arith.constant 0 : index
    %285 = vector.load %arg6[%c3_130, %c0_131, %c0_132] : memref<4x8x128xf32, #tpu.memory_space<vmem>>, vector<1x8x128xf32>
    %286 = vector.shape_cast %285 : vector<1x8x128xf32> to vector<8x128xf32>
    %287 = vector.shape_cast %284 : vector<8x128xf32> to vector<1x8x128xf32>
    tpu.vector_store %arg6[%c3_130, %c0_131, %c0_132], %287 {strides = array<i32>} : memref<4x8x128xf32, #tpu.memory_space<vmem>>, vector<1x8x128xf32>,
    return
  }
  func.func @transform_0(%arg0: i32) -> (i32, i32, i32) {
    %c0_i32 = arith.constant 0 : i32
    %c0_i32_0 = arith.constant 0 : i32
    %c0_i32_1 = arith.constant 0 : i32
    return %c0_i32, %arg0, %c0_i32_0 : i32, i32, i32
  }
  func.func @transform_1(%arg0: i32) -> (i32, i32) {
    %c0_i32 = arith.constant 0 : i32
    %c0_i32_0 = arith.constant 0 : i32
    %c0_i32_1 = arith.constant 0 : i32
    return %c0_i32, %c0_i32_0 : i32, i32
  }
  func.func @transform_2(%arg0: i32) -> i32 {
    %c0_i32 = arith.constant 0 : i32
    %c0_i32_0 = arith.constant 0 : i32
    return %c0_i32 : i32
  }
  func.func @transform_3(%arg0: i32) -> (i32, i32) {
    %c0_i32 = arith.constant 0 : i32
    %c0_i32_0 = arith.constant 0 : i32
    %c0_i32_1 = arith.constant 0 : i32
    return %c0_i32, %c0_i32_0 : i32, i32
  }
  func.func @transform_4(%arg0: i32) -> i32 {
    %c0_i32 = arith.constant 0 : i32
    %c0_i32_0 = arith.constant 0 : i32
    return %c0_i32 : i32
  }
  func.func @transform_5(%arg0: i32) -> (i32, i32, i32) {
    %c0_i32 = arith.constant 0 : i32
    %c0_i32_0 = arith.constant 0 : i32
    %c0_i32_1 = arith.constant 0 : i32
    return %c0_i32, %arg0, %c0_i32_0 : i32, i32, i32
  }
}

</mosaic_0001>

<bundles_post_ra>
// kernel: tpu_custom_call.1
= control target key start
LH: loop header
LB: loop body
LE: loop exit
PB: predicated region body
PF: predicated region fallthrough
CT: control target
= control target key end

     0   :  { %10 = vsyncpa [#allocation3], 0  ;;  %s872_s0 = inlined_call_operand.hbm [shape: f32[2,8,128], index: 0, kind: input, shape index: {}]   ;;  %s873_s1 = inlined_call_operand.vmem [shape: f32[8,2], index: 1, kind: input, shape index: {}]   ;;  %s874_s2 = inlined_call_operand.vmem [shape: f32[8], index: 2, kind: input, shape index: {}]   ;;  %s875_s3 = inlined_call_operand.vmem [shape: f32[4,8], index: 3, kind: input, shape index: {}]   ;;  %s876_s4 = inlined_call_operand.vmem [shape: f32[4], index: 4, kind: input, shape index: {}]   ;;  %s877_s5 = inlined_call_operand.hbm [shape: f32[4,8,128], index: 5, kind: output, shape index: {}]  }
   0x1   :  { %11 = vsyncpa [#allocation5], 0 }
   0x2   :  { %12 = vsyncpa [#allocation8], 0 }
   0x3   :  { %13 = vsyncpa [#allocation11], 0  ;;  %s43_s20 = sshll.u32 %s874_s2, 4  ;;  %s44_s20 = int_to_ptr.vmem [resolvable:$true] %s43_s20 }
   0x4   :  { %14 = vsyncpa [#allocation4], 0  ;;  %s473_s21 = scalar_lea.vmem %s44_s20, 16  ;;  %p478_p1 = scmp.lt.s32.totalorder %s44_s20, %s44_s20 }
   0x5   :  { %p474_p0 = scmp.ne.s32.totalorder %s44_s20, %s473_s21  ;;  %p479_p2 = scmp.lt.s32.totalorder %s473_s21, %s473_s21 }
   0x7   :  { %p480_p3 = por %p479_p2, %p478_p1 }
   0x9   :  { %p481_p4 = pnand %p480_p3, %p474_p0 }
   0xb   :  { %484 = shalt.err (!%p481_p4)
}
   0xc   :  { %s575_s22 = smov [#allocation7]   ;;  %s576_s23 = smov [#allocation2]  }
   0xd   :  { %46 = dma.vmem_to_smem %s44_s20, 16, %s575_s22, [#allocation8]  }
   0xe   :  { %s20_s24 = sshll.u32 %s576_s23, 4  ;;  %s485_s27 = scalar_lea.hbm %s872_s0, 256  ;;  %s21_s24 = int_to_ptr.vmem [resolvable:$true] %s20_s24 }
   0xf   :  { %p486_p5 = scmp.ne.s32.totalorder %s872_s0, %s485_s27  ;;  %p489_p6 = scmp.lt.u32.totalorder %s485_s27, %s872_s0 }
  0x11   :  { %p491_p7 = pnand %p489_p6, %p486_p5 }
  0x13   :  { %494 = shalt.err (!%p491_p7)
}
  0x14   :  { %s495_s6 = scalar_lea.vmem %s21_s24, 256  ;;  %p500_p9 = scmp.lt.s32.totalorder %s21_s24, %s21_s24 }
  0x15   :  { %p496_p8 = scmp.ne.s32.totalorder %s21_s24, %s495_s6  ;;  %p501_p10 = scmp.lt.s32.totalorder %s495_s6, %s495_s6 }
  0x17   :  { %p502_p11 = por %p501_p10, %p500_p9 }
  0x19   :  { %p503_p12 = pnand %p502_p11, %p496_p8 }
  0x1b   :  { %506 = shalt.err (!%p503_p12)
}
  0x1c   :  { %s577_s7 = smov 128   ;;  %s578_s8 = smov 8  }
  0x1d   :  { %26 = dma.hbm_to_vmem [thread:$0]  %s872_s0, 256, %s21_s24, [#allocation3], %s577_s7, %s577_s7, %s578_s8  }
  0x1e   :  { %s33_s13 = sshll.u32 %s873_s1, 4  ;;  %s53_s16 = sshll.u32 %s875_s3, 4  ;;  %s34_s13 = int_to_ptr.vmem [resolvable:$true] %s33_s13  ;;  %s54_s16 = int_to_ptr.vmem [resolvable:$true] %s53_s16 }
  0x1f   :  { %s507_s17 = scalar_lea.vmem %s34_s13, 128  ;;  %p512_p0 = scmp.lt.s32.totalorder %s34_s13, %s34_s13 }
  0x20   :  { %p508_p13 = scmp.ne.s32.totalorder %s34_s13, %s507_s17  ;;  %p513_p1 = scmp.lt.s32.totalorder %s507_s17, %s507_s17 }
  0x22   :  { %p514_p2 = por %p513_p1, %p512_p0 }
  0x24   :  { %p515_p3 = pnand %p514_p2, %p508_p13 }
  0x26   :  { %518 = shalt.err (!%p515_p3)
}
  0x27   :  { %s579_s18 = smov [#allocation6]   ;;  %s519_s0 = scalar_lea.vmem %s54_s16, 64 }
  0x28   :  { %36 = dma.vmem_to_smem %s34_s13, 128, %s579_s18, [#allocation5]  }
  0x29   :  { %p520_p4 = scmp.ne.s32.totalorder %s54_s16, %s519_s0  ;;  %p524_p5 = scmp.lt.s32.totalorder %s54_s16, %s54_s16 }
  0x2a   :  { %p525_p6 = scmp.lt.s32.totalorder %s519_s0, %s519_s0 }
  0x2c   :  { %p526_p7 = por %p525_p6, %p524_p5 }
  0x2e   :  { %p527_p8 = pnand %p526_p7, %p520_p4 }
  0x30   :  { %530 = shalt.err (!%p527_p8)
}
  0x31   :  { %s580_s1 = smov [#allocation9]   ;;  %s63_s20 = sshll.u32 %s876_s4, 4  ;;  %s64_s20 = int_to_ptr.vmem [resolvable:$true] %s63_s20 }
  0x32   :  { %56 = dma.vmem_to_smem %s54_s16, 64, %s580_s1, [#allocation8]  }
  0x33   :  { %s531_s21 = scalar_lea.vmem %s64_s20, 16  ;;  %p536_p10 = scmp.lt.s32.totalorder %s64_s20, %s64_s20 }
  0x34   :  { %p532_p9 = scmp.ne.s32.totalorder %s64_s20, %s531_s21  ;;  %p537_p11 = scmp.lt.s32.totalorder %s531_s21, %s531_s21 }
  0x36   :  { %p538_p12 = por %p537_p11, %p536_p10 }
  0x38   :  { %p539_p13 = pnand %p538_p12, %p532_p9 }
  0x3a   :  { %542 = shalt.err (!%p539_p13)
}
  0x3b   :  { %s581_s22 = smov [#allocation10]  }
  0x3c   :  { %66 = dma.vmem_to_smem %s64_s20, 16, %s581_s22, [#allocation11]  }
  0x3d   :  { %565 = dma.done.wait [#allocation3], 256  }
  0x3e   :  { %566 = vsyncadd [#allocation3], 4294967040 }
  0x3f   :  { %567 = dma.done.wait [#allocation5], 128  }
  0x40   :  { %568 = vsyncadd [#allocation5], 4294967168 }
  0x41   :  { %569 = dma.done.wait [#allocation8], 80  }
  0x42   :  { %570 = vsyncadd [#allocation8], 4294967216 }
  0x43   :  { %571 = dma.done.wait [#allocation11], 16  }
  0x44   :  { %572 = vsyncadd [#allocation11], 4294967280 }
  0x45   :  { %82 = sfence }
  0x46   :  { %s83_s4 = sld [smem:[#allocation6]]  ;;  %s377_s23 = sld [smem:[#allocation6 + $0x1]]  ;;  %v646_v0 = vld [vmem:[#allocation2] sm:$0xff]  ;;  %v648_v1 = vld [vmem:[#allocation2 + $0x8] sm:$0xff] }
  0x47   :  { %s378_s24 = sld [smem:[#allocation6 + $0x80]]  ;;  %s379_s25 = sld [smem:[#allocation6 + $0x81]] }
  0x48   :  { %s380_s26 = sld [smem:[#allocation6 + $0x100]]  ;;  %s381_s27 = sld [smem:[#allocation6 + $0x101]] }
  0x49   :  { %s382_s28 = sld [smem:[#allocation6 + $0x180]]  ;;  %s640_s2 = sld [smem:[#allocation6 + $0x181]] }
  0x4a   :  { %s642_s29 = sld [smem:[#allocation6 + $0x200]]  ;;  %s644_s30 = sld [smem:[#allocation6 + $0x201]] }
  0x4b   :  { %s650_s6 = sld [smem:[#allocation6 + $0x280]]  ;;  %s652_s9 = sld [smem:[#allocation6 + $0x281]] }
  0x4c   :  { %v146_v2 = vstv %s83_s4  ;;  %v148_v3 = vstv %s377_s23  ;;  %s654_s10 = sld [smem:[#allocation6 + $0x300]]  ;;  %s656_s11 = sld [smem:[#allocation6 + $0x301]] }
  0x4d   :  { %v147_v4 = vmul.f32 %v146_v2, %v646_v0  ;;  %v149_v5 = vmul.f32 %v148_v3, %v648_v1  ;;  %v167_v6 = vstv %s378_s24  ;;  %v169_v7 = vstv %s379_s25  ;;  %s660_s12 = sld [smem:[#allocation7]]  ;;  %s662_s13 = sld [smem:[#allocation7 + $0x1]] }
  0x4e   :  { %v168_v8 = vmul.f32 %v167_v6, %v646_v0  ;;  %v170_v9 = vmul.f32 %v169_v7, %v648_v1  ;;  %v192_v10 = vstv %s380_s26  ;;  %v194_v11 = vstv %s381_s27  ;;  %s666_s14 = sld [smem:[#allocation7 + $0x2]]  ;;  %s668_s15 = sld [smem:[#allocation7 + $0x3]] }
  0x4f   :  { %v193_v12 = vmul.f32 %v192_v10, %v646_v0  ;;  %v195_v13 = vmul.f32 %v194_v11, %v648_v1  ;;  %v217_v14 = vstv %s382_s28  ;;  %s672_s16 = sld [smem:[#allocation7 + $0x4]]  ;;  %s674_s17 = sld [smem:[#allocation7 + $0x5]]  ;;  %v150_v15 = vadd.f32 %v149_v5, %v147_v4 }
  0x50   :  { %v218_v16 = vmul.f32 %v217_v14, %v646_v0  ;;  %v219_v17 = vstv %s640_s2  ;;  %v242_v18 = vstv %s642_s29  ;;  %v171_v19 = vadd.f32 %v170_v9, %v168_v8  ;;  %s687_s18 = sld [smem:[#allocation7 + $0x6]]  ;;  %s691_s0 = sld [smem:[#allocation6 + $0x380]] }
  0x51   :  { %v220_v20 = vmul.f32 %v219_v17, %v648_v1  ;;  %v243_v21 = vmul.f32 %v242_v18, %v646_v0  ;;  %v244_v22 = vstv %s644_s30  ;;  %v196_v23 = vadd.f32 %v195_v13, %v193_v12  ;;  %s699_s1 = sld [smem:[#allocation6 + $0x381]]  ;;  %s711_s3 = sld [smem:[#allocation7 + $0x7]] }
  0x52   :  { %v245_v24 = vmul.f32 %v244_v22, %v648_v1  ;;  %v267_v25 = vstv %s650_s6  ;;  %v269_v26 = vstv %s652_s9  ;;  %v292_v40 = vstv %s654_s10  ;;  %s730_s19 = sld [smem:[#allocation9]]  ;;  %s732_s20 = sld [smem:[#allocation9 + $0x1]] }
  0x53   :  { %v221_v27 = vadd.f32 %v220_v20, %v218_v16  ;;  %v268_v28 = vmul.f32 %v267_v25, %v646_v0  ;;  %v270_v29 = vmul.f32 %v269_v26, %v648_v1  ;;  %v151_v30 = vstv %s660_s12  ;;  %s735_s21 = sld [smem:[#allocation9 + $0x2]]  ;;  %s737_s22 = sld [smem:[#allocation9 + $0x3]] }
  0x54   :  { %v172_v31 = vstv %s662_s13  ;;  %v246_v32 = vadd.f32 %v245_v24, %v243_v21  ;;  %v693_v33 = vadd.f32 %v151_v30, %v150_v15  ;;  %v197_v35 = vstv %s666_s14  ;;  %s740_s4 = sld [smem:[#allocation9 + $0x4]]  ;;  %s742_s23 = sld [smem:[#allocation9 + $0x5]] }
  0x55   :  { %v695_v34 = vadd.f32 %v172_v31, %v171_v19  ;;  %v222_v36 = vstv %s668_s15  ;;  %v701_v37 = vadd.f32 %v197_v35, %v196_v23  ;;  %v247_v39 = vstv %s672_s16  ;;  %s744_s24 = sld [smem:[#allocation9 + $0x6]]  ;;  %s748_s25 = sld [smem:[#allocation9 + $0x80]] }
  0x56   :  { %v703_v38 = vadd.f32 %v222_v36, %v221_v27  ;;  %v153_v41 = vsub.f32 0.0, %v693_v33  ;;  %v709_v43 = vadd.f32 %v247_v39, %v246_v32  ;;  %v271_v44 = vadd.f32 %v270_v29, %v268_v28  ;;  %s750_s26 = sld [smem:[#allocation9 + $0x81]]  ;;  %s752_s27 = sld [smem:[#allocation9 + $0x82]] }
  0x57   :  { %v174_v42 = vsub.f32 0.0, %v695_v34  ;;  %v199_v45 = vsub.f32 0.0, %v701_v37  ;;  %v272_v47 = vstv %s674_s17  ;;  %v294_v48 = vstv %s656_s11  ;;  %s755_s28 = sld [smem:[#allocation9 + $0x83]]  ;;  %s757_s2 = sld [smem:[#allocation9 + $0x84]] }
  0x58   :  { %v224_v46 = vsub.f32 0.0, %v703_v38  ;;  %v154_v49 = vmul.f32 1.442695, %v153_v41  ;;  %v293_v51 = vmul.f32 %v292_v40, %v646_v0  ;;  %v249_v54 = vsub.f32 0.0, %v709_v43  ;;  %s759_s29 = sld [smem:[#allocation9 + $0x85]]  ;;  %s761_s30 = sld [smem:[#allocation9 + $0x86]] }
  0x59   :  { %v175_v50 = vmul.f32 1.442695, %v174_v42  ;;  %v200_v52 = vmul.f32 1.442695, %v199_v45  ;;  %v719_v55 = vadd.f32 %v272_v47, %v271_v44  ;;  %v295_v56 = vmul.f32 %v294_v48, %v648_v1  ;;  %s763_s6 = sld [smem:[#allocation9 + $0x100]]  ;;  %s765_s9 = sld [smem:[#allocation9 + $0x101]] }
  0x5a   :  { %v225_v53 = vmul.f32 1.442695, %v224_v46  ;;  %441 = vpow2.f32 %v154_v49  ;;  %v250_v57 = vmul.f32 1.442695, %v249_v54  ;;  %v297_v58 = vstv %s687_s18  ;;  %s767_s10 = sld [smem:[#allocation9 + $0x102]]  ;;  %s769_s11 = sld [smem:[#allocation9 + $0x103]] }
  0x5b   :  { %443 = vpow2.f32 %v175_v50  ;;  %v274_v59 = vsub.f32 0.0, %v719_v55  ;;  %v296_v60 = vadd.f32 %v295_v56, %v293_v51  ;;  %v317_v61 = vstv %s691_s0  ;;  %s771_s12 = sld [smem:[#allocation9 + $0x104]]  ;;  %s773_s13 = sld [smem:[#allocation9 + $0x105]] }
  0x5c   :  { %445 = vpow2.f32 %v200_v52  ;;  %v318_v62 = vmul.f32 %v317_v61, %v646_v0  ;;  %v319_v63 = vstv %s699_s1  ;;  %v322_v5 = vstv %s711_s3  ;;  %s775_s14 = sld [smem:[#allocation9 + $0x106]]  ;;  %s777_s15 = sld [smem:[#allocation9 + $0x180]] }
  0x5d   :  { %447 = vpow2.f32 %v225_v53  ;;  %v275_v2 = vmul.f32 1.442695, %v274_v59  ;;  %v727_v3 = vadd.f32 %v297_v58, %v296_v60  ;;  %v320_v4 = vmul.f32 %v319_v63, %v648_v1  ;;  %s779_s16 = sld [smem:[#allocation9 + $0x181]]  ;;  %s781_s17 = sld [smem:[#allocation9 + $0x182]] }
  0x5e   :  { %449 = vpow2.f32 %v250_v57  ;;  %s783_s18 = sld [smem:[#allocation9 + $0x183]]  ;;  %v159_v22 = vstv %s730_s19  ;;  %v180_v23 = vstv %s732_s20  ;;  %v205_v24 = vstv %s735_s21  ;;  %s807_s0 = sld [smem:[#allocation9 + $0x184]] }
  0x5f   :  { %451 = vpow2.f32 %v275_v2  ;;  %v299_v6 = vsub.f32 0.0, %v727_v3  ;;  %v321_v0 = vadd.f32 %v320_v4, %v318_v62  ;;  %v230_v25 = vstv %s737_s22  ;;  %s817_s1 = sld [smem:[#allocation9 + $0x185]]  ;;  %s819_s3 = sld [smem:[#allocation9 + $0x186]] }
  0x60   :  { %v255_v26 = vstv %s740_s4  ;;  %v280_v28 = vstv %s742_s23  ;;  %v305_v29 = vstv %s744_s24  ;;  %v161_v30 = vstv %s748_s25  ;;  %s822_s19 = sld [smem:[#allocation9 + $0x7]]  ;;  %s832_s4 = sld [smem:[#allocation10]] }
  0x61   :  { %v300_v1 = vmul.f32 1.442695, %v299_v6  ;;  %v746_v7 = vadd.f32 %v322_v5, %v321_v0  ;;  %v183_v31 = vstv %s750_s26  ;;  %v208_v35 = vstv %s752_s27  ;;  %s824_s20 = sld [smem:[#allocation9 + $0x87]]  ;;  %s838_s23 = sld [smem:[#allocation10 + $0x1]] }
  0x62   :  { %v233_v36 = vstv %s755_s28  ;;  %v258_v39 = vstv %s757_s2  ;;  %v283_v40 = vstv %s759_s29  ;;  %v308_v41 = vstv %s761_s30  ;;  %s827_s21 = sld [smem:[#allocation9 + $0x107]]  ;;  %s842_s25 = sld [smem:[#allocation10 + $0x2]] }
  0x63   :  { %453 = vpow2.f32 %v300_v1  ;;  %v324_v9 = vsub.f32 0.0, %v746_v7  ;;  %v163_v42 = vstv %s763_s6  ;;  %v186_v44 = vstv %s765_s9  ;;  %s829_s22 = sld [smem:[#allocation9 + $0x187]]  ;;  %s846_s26 = sld [smem:[#allocation10 + $0x3]] }
  0x64   :  { %v442_v8 = vpop.eup %441  ;;  %v211_v46 = vstv %s767_s10  ;;  %v236_v47 = vstv %s769_s11  ;;  %v261_v48 = vstv %s771_s12  ;;  %v286_v51 = vstv %s773_s13  ;;  %s582_s24 = smov [#allocation12]  }
  0x65   :  { %v444_v10 = vpop.eup %443  ;;  %v156_v11 = vadd.f32 1.0, %v442_v8  ;;  %v325_v18 = vmul.f32 1.442695, %v324_v9  ;;  %v311_v52 = vstv %s775_s14  ;;  %v165_v53 = vstv %s777_s15  ;;  %s362_s27 = sshll.u32 %s582_s24, 4  ;;  %s363_s27 = int_to_ptr.vmem [resolvable:$true] %s362_s27 }
  0x66   :  { %v446_v12 = vpop.eup %445  ;;  %v177_v13 = vadd.f32 1.0, %v444_v10  ;;  %v189_v57 = vstv %s779_s16  ;;  %v214_v58 = vstv %s781_s17  ;;  %v239_v59 = vstv %s783_s18  ;;  %s543_s28 = scalar_lea.vmem %s363_s27, 512  ;;  %p548_p1 = scmp.lt.s32.totalorder %s363_s27, %s363_s27 }
  0x67   :  { %v448_v14 = vpop.eup %447  ;;  %455 = vrcp.f32 %v156_v11  ;;  %v202_v15 = vadd.f32 1.0, %v446_v12  ;;  %p544_p0 = scmp.ne.s32.totalorder %s363_s27, %s543_s28  ;;  %p549_p2 = scmp.lt.s32.totalorder %s543_s28, %s543_s28 }
  0x68   :  { %v450_v16 = vpop.eup %449  ;;  %457 = vrcp.f32 %v177_v13  ;;  %v227_v17 = vadd.f32 1.0, %v448_v14 }
  0x69   :  { %459 = vrcp.f32 %v202_v15  ;;  %v252_v19 = vadd.f32 1.0, %v450_v16  ;;  %v452_v20 = vpop.eup %451  ;;  %p550_p3 = por %p549_p2, %p548_p1 }
  0x6a   :  { %461 = vrcp.f32 %v227_v17  ;;  %v277_v21 = vadd.f32 1.0, %v452_v20 }
  0x6b   :  { %463 = vrcp.f32 %v252_v19  ;;  %p551_p4 = pnand %p550_p3, %p544_p0 }
  0x6c   :  { %465 = vpow2.f32 %v325_v18 }
  0x6d   :  { %467 = vrcp.f32 %v277_v21  ;;  %v454_v27 = vpop.eup %453 }
  0x6e   :  { %v302_v32 = vadd.f32 1.0, %v454_v27 }
  0x70   :  { %469 = vrcp.f32 %v302_v32 }
  0x71   :  { %v456_v45 = vpop.eup %455 }
  0x72   :  { %v458_v49 = vpop.eup %457  ;;  %v158_v50 = vmul.f32 %v456_v45, %v693_v33  ;;  %v289_v45 = vstv %s817_s1 }
  0x73   :  { %v460_v54 = vpop.eup %459  ;;  %v179_v56 = vmul.f32 %v458_v49, %v695_v34 }
  0x74   :  { %v462_v60 = vpop.eup %461  ;;  %v160_v61 = vmul.f32 %v159_v22, %v158_v50  ;;  %v204_v62 = vmul.f32 %v460_v54, %v701_v37  ;;  %v162_v63 = vmul.f32 %v161_v30, %v158_v50  ;;  %v164_v2 = vmul.f32 %v163_v42, %v158_v50 }
  0x75   :  { %v464_v4 = vpop.eup %463  ;;  %v181_v5 = vmul.f32 %v180_v23, %v179_v56  ;;  %v229_v33 = vmul.f32 %v462_v60, %v703_v38  ;;  %v184_v6 = vmul.f32 %v183_v31, %v179_v56  ;;  %v187_v0 = vmul.f32 %v186_v44, %v179_v56 }
  0x76   :  { %v466_v1 = vpop.eup %465  ;;  %v206_v8 = vmul.f32 %v205_v24, %v204_v62  ;;  %v254_v9 = vmul.f32 %v464_v4, %v709_v43  ;;  %v209_v34 = vmul.f32 %v208_v35, %v204_v62  ;;  %v212_v10 = vmul.f32 %v211_v46, %v204_v62 }
  0x77   :  { %v468_v11 = vpop.eup %467  ;;  %v182_v37 = vadd.f32 %v181_v5, %v160_v61  ;;  %v231_v12 = vmul.f32 %v230_v25, %v229_v33  ;;  %v327_v13 = vadd.f32 1.0, %v466_v1  ;;  %v185_v14 = vadd.f32 %v184_v6, %v162_v63 }
  0x78   :  { %v256_v15 = vmul.f32 %v255_v26, %v254_v9  ;;  %v279_v38 = vmul.f32 %v468_v11, %v719_v55  ;;  %v234_v16 = vmul.f32 %v233_v36, %v229_v33  ;;  %v259_v17 = vmul.f32 %v258_v39, %v254_v9 }
  0x79   :  { %v207_v18 = vadd.f32 %v206_v8, %v182_v37  ;;  %471 = vrcp.f32 %v327_v13  ;;  %v210_v43 = vadd.f32 %v209_v34, %v185_v14  ;;  %v188_v19 = vadd.f32 %v187_v0, %v164_v2 }
  0x7a   :  { %v281_v20 = vmul.f32 %v280_v28, %v279_v38  ;;  %v284_v21 = vmul.f32 %v283_v40, %v279_v38  ;;  %v237_v22 = vmul.f32 %v236_v47, %v229_v33  ;;  %v264_v23 = vstv %s807_s0  ;;  %v470_v24 = vpop.eup %469 }
  0x7b   :  { %v232_v25 = vadd.f32 %v231_v12, %v207_v18  ;;  %v235_v27 = vadd.f32 %v234_v16, %v210_v43  ;;  %v213_v55 = vadd.f32 %v212_v10, %v188_v19  ;;  %v262_v26 = vmul.f32 %v261_v48, %v254_v9 }
  0x7c   :  { %v304_v30 = vmul.f32 %v470_v24, %v727_v3  ;;  %v166_v28 = vmul.f32 %v165_v53, %v158_v50  ;;  %v190_v31 = vmul.f32 %v189_v57, %v179_v56  ;;  %v215_v32 = vmul.f32 %v214_v58, %v204_v62 }
  0x7d   :  { %v257_v35 = vadd.f32 %v256_v15, %v232_v25  ;;  %v260_v36 = vadd.f32 %v259_v17, %v235_v27  ;;  %v238_v39 = vadd.f32 %v237_v22, %v213_v55  ;;  %v287_v40 = vmul.f32 %v286_v51, %v279_v38 }
  0x7e   :  { %v191_v42 = vadd.f32 %v190_v31, %v166_v28  ;;  %v240_v44 = vmul.f32 %v239_v59, %v229_v33  ;;  %v314_v46 = vstv %s819_s3  ;;  %v306_v3 = vmul.f32 %v305_v29, %v304_v30 }
  0x7f   :  { %v282_v47 = vadd.f32 %v281_v20, %v257_v35  ;;  %v309_v48 = vmul.f32 %v308_v41, %v304_v30  ;;  %v263_v49 = vadd.f32 %v262_v26, %v238_v39  ;;  %v285_v50 = vadd.f32 %v284_v21, %v260_v36 }
  0x80   :  { %v312_v51 = vmul.f32 %v311_v52, %v304_v30  ;;  %v216_v53 = vadd.f32 %v215_v32, %v191_v42  ;;  %v265_v54 = vmul.f32 %v264_v23, %v254_v9  ;;  %v330_v57 = vstv %s822_s19 }
  0x81   :  { %v288_v56 = vadd.f32 %v287_v40, %v263_v49  ;;  %v333_v58 = vstv %s824_s20  ;;  %v290_v59 = vmul.f32 %v289_v45, %v279_v38  ;;  %v307_v60 = vadd.f32 %v306_v3, %v282_v47 }
  0x82   :  { %v241_v29 = vadd.f32 %v240_v44, %v216_v53  ;;  %v336_v61 = vstv %s827_s21  ;;  %v315_v62 = vmul.f32 %v314_v46, %v304_v30  ;;  %v339_v63 = vstv %s829_s22 }
  0x83   :  { %v472_v41 = vpop.eup %471  ;;  %v310_v52 = vadd.f32 %v309_v48, %v285_v50  ;;  %v313_v4 = vadd.f32 %v312_v51, %v288_v56  ;;  %v342_v8 = vstv %s832_s4  ;;  %v345_v9 = vstv %s838_s23 }
  0x84   :  { %v329_v2 = vmul.f32 %v472_v41, %v746_v7  ;;  %v266_v5 = vadd.f32 %v265_v54, %v241_v29  ;;  %v349_v34 = vstv %s842_s25  ;;  %v353_v14 = vstv %s846_s26 }
  0x86   :  { %v331_v33 = vmul.f32 %v330_v57, %v329_v2  ;;  %v334_v6 = vmul.f32 %v333_v58, %v329_v2  ;;  %v337_v0 = vmul.f32 %v336_v61, %v329_v2  ;;  %v291_v1 = vadd.f32 %v290_v59, %v266_v5 }
  0x87   :  { %v340_v10 = vmul.f32 %v339_v63, %v329_v2 }
  0x88   :  { %v332_v11 = vadd.f32 %v331_v33, %v307_v60  ;;  %v335_v37 = vadd.f32 %v334_v6, %v310_v52  ;;  %v338_v12 = vadd.f32 %v337_v0, %v313_v4  ;;  %v316_v13 = vadd.f32 %v315_v62, %v291_v1 }
  0x8a   :  { %v343_v7 = vadd.f32 %v342_v8, %v332_v11  ;;  %v346_v15 = vadd.f32 %v345_v9, %v335_v37  ;;  %v350_v38 = vadd.f32 %v349_v34, %v338_v12  ;;  %v341_v16 = vadd.f32 %v340_v10, %v316_v13 }
  0x8c   :  { %344 = vst [vmem:[#allocation12] sm:$0xff] %v343_v7  ;;  %348 = vst [vmem:[#allocation12 + $0x8] sm:$0xff] %v346_v15  ;;  %v354_v17 = vadd.f32 %v353_v14, %v341_v16 }
  0x8d   :  { %352 = vst [vmem:[#allocation12 + $0x10] sm:$0xff] %v350_v38 }
  0x8e   :  { %356 = vst [vmem:[#allocation12 + $0x18] sm:$0xff] %v354_v17 }
  0x8f   :  { %554 = shalt.err (!%p551_p4)
}
  0x90   :  { %s555_s30 = scalar_lea.hbm %s877_s5, 512 }
  0x91   :  { %p556_p5 = scmp.ne.s32.totalorder %s877_s5, %s555_s30  ;;  %p559_p6 = scmp.lt.u32.totalorder %s555_s30, %s877_s5 }
  0x93   :  { %p561_p7 = pnand %p559_p6, %p556_p5 }
  0x95   :  { %564 = shalt.err (!%p561_p7)
}
  0x96   :  { %368 = dma.vmem_to_hbm [thread:$0]  %s363_s27, 512, %s877_s5, [#allocation4], %s577_s7, %s577_s7, %s578_s8  }
  0x97   :  { %573 = dma.done.wait [#allocation4], 512  }
  0x98   :  { %574 = vsyncadd [#allocation4], 4294966784 }
  0x99   :  { %372 = vsyncpa [#allocation3], 1 }
  0x9a   :  { %373 = vsyncpa [#allocation4], 1 }
  0x9b   :  { %374 = vsyncpa [#allocation5], 1 }
  0x9c   :  { %375 = vsyncpa [#allocation8], 1 }
  0x9d   :  { %376 = vsyncpa [#allocation11], 1 }

</bundles_post_ra>
